<compile_context>
chip_gen: v7x
topology: tpu7x:2x2x1
jax: 0.10.0
libtpu: 0.0.40
codegen_flags: <defaults>
</compile_context>

<pallas_src>
import functools

import jax
import jax.numpy as jnp
from jax.experimental import pallas as pl
from jax.experimental.pallas import tpu as pltpu

LANE = 128


def _round_up(v, m):
    return ((v + m - 1) // m) * m


def _pad2d(x, rows, cols):
    r, c = x.shape
    return jnp.pad(x, ((0, rows - r), (0, cols - c)))


def _vmem_limit(bytes_needed):
    # Accurate per-step estimate + slack; floor at v5e's 16 MiB default scoped
    # limit, cap well under v7x's 64 MiB physical VMEM.
    return int(min(max(bytes_needed + (2 << 20), 16 << 20), 48 << 20))


# ---------------------------------------------------------------------------
# Fused single-call kernel (VMEM-resident sizes): A is read from HBM once and
# the H1/G1 intermediates never round-trip through HBM.
# ---------------------------------------------------------------------------
def _fused_kernel(a_ref, xw1_ref, b1_ref, w2_ref, b2_ref, wf_ref, bf_ref,
                  out_ref):
    bf16 = jnp.bfloat16
    h1 = jnp.maximum(
        jnp.dot(a_ref[...], xw1_ref[...], preferred_element_type=jnp.float32)
        + b1_ref[...], 0.0)
    g1 = jnp.dot(h1.astype(bf16), w2_ref[...],
                 preferred_element_type=jnp.float32)
    h2 = jnp.maximum(
        jnp.dot(a_ref[...], g1.astype(bf16),
                preferred_element_type=jnp.float32)
        + b2_ref[...], 0.0)
    out_ref[...] = (jnp.dot(h2.astype(bf16), wf_ref[...],
                            preferred_element_type=jnp.float32)
                    + bf_ref[...]).astype(out_ref.dtype)


# ---------------------------------------------------------------------------
# Tiled path, kernel 1:  G1 = ReLU(A @ XW1 + b1) @ W2
#   grid = (row tiles, contraction tiles); f32 VMEM accumulator (P3 pattern).
# ---------------------------------------------------------------------------
def _g1_kernel(a_ref, xw1_ref, b1_ref, w2_ref, g1_ref, acc_ref):
    k = pl.program_id(1)

    @pl.when(k == 0)
    def _():
        acc_ref[...] = jnp.zeros_like(acc_ref)

    acc_ref[...] += jnp.dot(a_ref[...], xw1_ref[...],
                            preferred_element_type=jnp.float32)

    @pl.when(k == pl.num_programs(1) - 1)
    def _():
        h1 = jnp.maximum(acc_ref[...] + b1_ref[...], 0.0)
        g1_ref[...] = jnp.dot(h1.astype(jnp.bfloat16), w2_ref[...],
                              preferred_element_type=jnp.float32
                              ).astype(g1_ref.dtype)


# ---------------------------------------------------------------------------
# Tiled path, kernel 2:  OUT = ReLU(A @ G1 + b2) @ Wf + bf
# ---------------------------------------------------------------------------
def _out_kernel(a_ref, g1_ref, b2_ref, wf_ref, bf_ref, out_ref, acc_ref):
    k = pl.program_id(1)

    @pl.when(k == 0)
    def _():
        acc_ref[...] = jnp.zeros_like(acc_ref)

    acc_ref[...] += jnp.dot(a_ref[...], g1_ref[...],
                            preferred_element_type=jnp.float32)

    @pl.when(k == pl.num_programs(1) - 1)
    def _():
        h2 = jnp.maximum(acc_ref[...] + b2_ref[...], 0.0)
        out_ref[...] = (jnp.dot(h2.astype(jnp.bfloat16), wf_ref[...],
                                preferred_element_type=jnp.float32)
                        + bf_ref[...]).astype(out_ref.dtype)


@functools.partial(jax.jit, static_argnames=("tm", "mode"))
def gcn_forward(a_hat, x, w1, b1, w2, b2, wf, bf, *, tm=256, mode="auto"):
    """GCN forward: fc(relu(conv2(relu(conv1(x))))) with dense A_hat."""
    if mode not in ("auto", "fused", "tiled"):
        raise ValueError(f"unknown mode: {mode}")

    n, _ = x.shape
    h1_dim = w1.shape[1]
    h2_dim = w2.shape[1]
    c = wf.shape[1]

    bf16 = jnp.bfloat16
    h1p = _round_up(h1_dim, LANE)
    h2p = _round_up(h2_dim, LANE)
    cp = _round_up(c, LANE)

    # Hoisted first feature transform (GCNConv canonical A @ (X @ W1) order).
    xw1 = jnp.dot(x.astype(bf16), w1.astype(bf16),
                  preferred_element_type=jnp.float32)           # [N, H1] f32

    # Weight / bias operands zero-padded to 128 lanes (unmasked MXU tiles,
    # lane-dense stores); biases stay f32 for the VPU add.
    w2_b = _pad2d(w2, h1p, h2p).astype(bf16)
    wf_b = _pad2d(wf, h2p, cp).astype(bf16)
    b1_p = _pad2d(b1.reshape(1, -1), 1, h1p).astype(jnp.float32)
    b2_p = _pad2d(b2.reshape(1, -1), 1, h2p).astype(jnp.float32)
    bf_p = _pad2d(bf.reshape(1, -1), 1, cp).astype(jnp.float32)

    # ---- path selection -----------------------------------------------------
    np_small = _round_up(n, 8)
    fused_bytes = (np_small * np_small * 2                 # A (bf16)
                   + np_small * (h1p + cp) * 2             # XW1 + OUT (bf16)
                   + 4 * np_small * (h1p + h2p + cp)       # f32 intermediates
                   + (h1p * h2p + h2p * cp) * 2
                   + (h1p + h2p + cp) * 4)

    if mode == "fused" or (mode == "auto" and fused_bytes <= (20 << 20)):
        # ---- fused single pallas_call (demo / small-graph path) -------------
        np_ = np_small
        a_b = _pad2d(a_hat, np_, np_).astype(bf16)
        xw1_b = _pad2d(xw1, np_, h1p).astype(bf16)
        cost = pl.CostEstimate(
            flops=int(2 * np_ * np_ * (h1p + h2p)
                      + 2 * np_ * (h1p * h2p + h2p * cp)),
            transcendentals=0,
            bytes_accessed=int(fused_bytes))
        out_p = pl.pallas_call(
            _fused_kernel,
            out_shape=jax.ShapeDtypeStruct((np_, cp), bf16),
            grid=(1,),
            in_specs=[
                pl.BlockSpec((np_, np_), lambda i: (0, 0)),    # A
                pl.BlockSpec((np_, h1p), lambda i: (0, 0)),    # XW1
                pl.BlockSpec((1, h1p), lambda i: (0, 0)),      # b1
                pl.BlockSpec((h1p, h2p), lambda i: (0, 0)),    # W2
                pl.BlockSpec((1, h2p), lambda i: (0, 0)),      # b2
                pl.BlockSpec((h2p, cp), lambda i: (0, 0)),     # Wf
                pl.BlockSpec((1, cp), lambda i: (0, 0)),       # bf
            ],
            out_specs=pl.BlockSpec((np_, cp), lambda i: (0, 0)),
            compiler_params=pltpu.CompilerParams(
                dimension_semantics=("arbitrary",),
                vmem_limit_bytes=_vmem_limit(fused_bytes)),
            cost_estimate=cost,
        )(a_b, xw1_b, b1_p, w2_b, b2_p, wf_b, bf_p)
        return out_p[:n, :c].astype(jnp.float32)

    # ---- large-graph path: row tiles x contraction tiles ---------------------
    tm_eff = min(tm, _round_up(n, 8))
    tk = tm_eff
    np_ = _round_up(n, tm_eff)
    nt = np_ // tm_eff
    nk = np_ // tk

    a_b = _pad2d(a_hat, np_, np_).astype(bf16)
    xw1_b = _pad2d(xw1, np_, h1p).astype(bf16)

    # kernel 1: G1 = ReLU(A @ XW1 + b1) @ W2  (G1 kept in bf16, lane-dense)
    blk1 = (2 * (tm_eff * tk * 2 + tk * h1p * 2 + tm_eff * h2p * 2
                 + h1p * 4 + h1p * h2p * 2)
            + tm_eff * h1p * 4)
    cost1 = pl.CostEstimate(
        flops=int(2 * np_ * np_ * h1p + 2 * np_ * h1p * h2p),
        transcendentals=0,
        bytes_accessed=int(np_ * np_ * 2 + nt * np_ * h1p * 2
                           + np_ * h2p * 2 + h1p * h2p * 2 + h1p * 4))
    g1 = pl.pallas_call(
        _g1_kernel,
        out_shape=jax.ShapeDtypeStruct((np_, h2p), bf16),
        grid=(nt, nk),
        in_specs=[
            pl.BlockSpec((tm_eff, tk), lambda i, k: (i, k)),   # A tile
            pl.BlockSpec((tk, h1p), lambda i, k: (k, 0)),      # XW1 k-slab
            pl.BlockSpec((1, h1p), lambda i, k: (0, 0)),       # b1 (invariant)
            pl.BlockSpec((h1p, h2p), lambda i, k: (0, 0)),     # W2 (invariant)
        ],
        out_specs=pl.BlockSpec((tm_eff, h2p), lambda i, k: (i, 0)),
        scratch_shapes=[pltpu.VMEM((tm_eff, h1p), jnp.float32)],
        compiler_params=pltpu.CompilerParams(
            dimension_semantics=("parallel", "arbitrary"),
            vmem_limit_bytes=_vmem_limit(blk1)),
        cost_estimate=cost1,
    )(a_b, xw1_b, b1_p, w2_b)

    # kernel 2: OUT = ReLU(A @ G1 + b2) @ Wf + bf   (bf16 output, sliced later)
    blk2 = (2 * (tm_eff * tk * 2 + tk * h2p * 2 + tm_eff * cp * 2
                 + h2p * 4 + h2p * cp * 2 + cp * 4)
            + tm_eff * h2p * 4)
    cost2 = pl.CostEstimate(
        flops=int(2 * np_ * np_ * h2p + 2 * np_ * h2p * cp),
        transcendentals=0,
        bytes_accessed=int(np_ * np_ * 2 + nt * np_ * h2p * 2
                           + np_ * cp * 2 + h2p * cp * 2 + (h2p + cp) * 4))
    out_p = pl.pallas_call(
        _out_kernel,
        out_shape=jax.ShapeDtypeStruct((np_, cp), bf16),
        grid=(nt, nk),
        in_specs=[
            pl.BlockSpec((tm_eff, tk), lambda i, k: (i, k)),   # A tile
            pl.BlockSpec((tk, h2p), lambda i, k: (k, 0)),      # G1 k-slab
            pl.BlockSpec((1, h2p), lambda i, k: (0, 0)),       # b2 (invariant)
            pl.BlockSpec((h2p, cp), lambda i, k: (0, 0)),      # Wf (invariant)
            pl.BlockSpec((1, cp), lambda i, k: (0, 0)),        # bf (invariant)
        ],
        out_specs=pl.BlockSpec((tm_eff, cp), lambda i, k: (i, 0)),
        scratch_shapes=[pltpu.VMEM((tm_eff, h2p), jnp.float32)],
        compiler_params=pltpu.CompilerParams(
            dimension_semantics=("parallel", "arbitrary"),
            vmem_limit_bytes=_vmem_limit(blk2)),
        cost_estimate=cost2,
    )(a_b, g1, b2_p, wf_b, bf_p)

    return out_p[:n, :c].astype(jnp.float32)


def build_normalized_adjacency(edge_index, num_nodes):
    """Dense equivalent of PyG GCNConv propagation:
    A_hat = D^-1/2 (A + I) D^-1/2, with A[dst, src] += 1 per edge. The demo
    graph has no pre-existing self-loops, so adding the identity matches
    add_remaining_self_loops."""
    src = edge_index[0]
    dst = edge_index[1]
    a = jnp.zeros((num_nodes, num_nodes), dtype=jnp.float32)
    a = a.at[dst, src].add(1.0)
    a = a + jnp.eye(num_nodes, dtype=jnp.float32)
    deg = jnp.sum(a, axis=1)
    d_inv_sqrt = jnp.where(deg > 0, 1.0 / jnp.sqrt(deg), 0.0)
    return d_inv_sqrt[:, None] * a * d_inv_sqrt[None, :]


if __name__ == "__main__":
    # Small, deterministic synthetic problem.
    num_nodes = 256
    num_features = 16
    hidden_dim1 = 64
    hidden_dim2 = 32
    num_classes = 8

    key = jax.random.PRNGKey(0)
    k_x, k_w1, k_b1, k_w2, k_b2, k_wf, k_bf = jax.random.split(key, 7)

    x = jax.random.normal(k_x, (num_nodes, num_features), jnp.float32)

    # Undirected ring graph as edge_index [2, E] (both directions).
    srcs = jnp.arange(num_nodes, dtype=jnp.int32)
    dsts = (srcs + 1) % num_nodes
    edge_index = jnp.concatenate(
        [jnp.stack([srcs, dsts], axis=0), jnp.stack([dsts, srcs], axis=0)],
        axis=1)

    a_hat = build_normalized_adjacency(edge_index, num_nodes)

    # Deterministic parameter init (shapes follow GCNConv / Linear).
    w1 = jax.random.normal(k_w1, (num_features, hidden_dim1), jnp.float32) * 0.1
    b1 = jax.random.normal(k_b1, (hidden_dim1,), jnp.float32) * 0.1
    w2 = jax.random.normal(k_w2, (hidden_dim1, hidden_dim2), jnp.float32) * 0.1
    b2 = jax.random.normal(k_b2, (hidden_dim2,), jnp.float32) * 0.1
    wf = jax.random.normal(k_wf, (hidden_dim2, num_classes), jnp.float32) * 0.1
    bf = jax.random.normal(k_bf, (num_classes,), jnp.float32) * 0.1

    # Auto mode selects the fused single-kernel path at this VMEM-resident size.
    out = gcn_forward(a_hat, x, w1, b1, w2, b2, wf, bf)
    out = jax.block_until_ready(out)
    assert out.shape == (num_nodes, num_classes)

    # Also exercise the large-graph tiled path (row tiles x contraction tiles;
    # tm=128 here gives grid=(2, 2) so the accumulator logic is validated).
    out_tiled = gcn_forward(a_hat, x, w1, b1, w2, b2, wf, bf,
                            tm=128, mode="tiled")
    out_tiled = jax.block_until_ready(out_tiled)
    assert out_tiled.shape == (num_nodes, num_classes)

    # Reference 1: same math with matching bf16 operands / f32 accumulation.
    bf16 = jnp.bfloat16

    def bdot(a, b):
        return jnp.dot(a.astype(bf16), b.astype(bf16),
                       preferred_element_type=jnp.float32)

    xw1_r = bdot(x, w1)
    h1_r = jnp.maximum(bdot(a_hat, xw1_r) + b1[None, :], 0.0)
    g1_r = bdot(h1_r, w2)
    h2_r = jnp.maximum(bdot(a_hat, g1_r) + b2[None, :], 0.0)
    ref_bf16 = (bdot(h2_r, wf) + bf[None, :]).astype(bf16).astype(jnp.float32)
    assert jnp.allclose(out, ref_bf16, atol=2e-2, rtol=2e-2)
    assert jnp.allclose(out_tiled, ref_bf16, atol=2e-2, rtol=2e-2)

    # Reference 2: full-f32 original module math (looser tol for bf16 operands).
    h1_f = jnp.maximum(a_hat @ (x @ w1) + b1[None, :], 0.0)
    h2_f = jnp.maximum(a_hat @ (h1_f @ w2) + b2[None, :], 0.0)
    ref_f32 = h2_f @ wf + bf[None, :]
    assert jnp.allclose(out, ref_f32, atol=5e-2, rtol=5e-2)
    assert jnp.allclose(out_tiled, ref_f32, atol=5e-2, rtol=5e-2)

    print("KERNEL_OK")
</pallas_src>

<mosaic_0001>
module attributes {stable_mosaic.version = 11 : i64} {
  func.func @_fused_kernel(%arg0: i32, %arg1: memref<256x256xbf16, #tpu.memory_space<vmem>>, %arg2: memref<256x128xbf16, #tpu.memory_space<vmem>>, %arg3: memref<1x128xf32, #tpu.memory_space<vmem>>, %arg4: memref<128x128xbf16, #tpu.memory_space<vmem>>, %arg5: memref<1x128xf32, #tpu.memory_space<vmem>>, %arg6: memref<128x128xbf16, #tpu.memory_space<vmem>>, %arg7: memref<1x128xf32, #tpu.memory_space<vmem>>, %arg8: memref<256x128xbf16, #tpu.memory_space<vmem>>) attributes {dimension_semantics = [#tpu.dimension_semantics<arbitrary>], iteration_bounds = array<i64: 1>, scalar_prefetch = 0 : i64, scratch_operands = 0 : i64, tpu.core_type = #tpu.core_type<tc>, window_params = [{pipeline_mode = #tpu.pipeline_mode<synchronous>, transform_indices = @transform_0, window_bounds = array<i64: 256, 256>}, {pipeline_mode = #tpu.pipeline_mode<synchronous>, transform_indices = @transform_1, window_bounds = array<i64: 256, 128>}, {pipeline_mode = #tpu.pipeline_mode<synchronous>, transform_indices = @transform_2, window_bounds = array<i64: 1, 128>}, {pipeline_mode = #tpu.pipeline_mode<synchronous>, transform_indices = @transform_3, window_bounds = array<i64: 128, 128>}, {pipeline_mode = #tpu.pipeline_mode<synchronous>, transform_indices = @transform_4, window_bounds = array<i64: 1, 128>}, {pipeline_mode = #tpu.pipeline_mode<synchronous>, transform_indices = @transform_5, window_bounds = array<i64: 128, 128>}, {pipeline_mode = #tpu.pipeline_mode<synchronous>, transform_indices = @transform_6, window_bounds = array<i64: 1, 128>}, {pipeline_mode = #tpu.pipeline_mode<synchronous>, transform_indices = @transform_7, window_bounds = array<i64: 256, 128>}]} {
    %c0 = arith.constant 0 : index
    %c0_0 = arith.constant 0 : index
    %0 = vector.load %arg1[%c0, %c0_0] : memref<256x256xbf16, #tpu.memory_space<vmem>>, vector<256x256xbf16>
    %c0_1 = arith.constant 0 : index
    %c0_2 = arith.constant 0 : index
    %1 = vector.load %arg2[%c0_1, %c0_2] : memref<256x128xbf16, #tpu.memory_space<vmem>>, vector<256x128xbf16>
    %cst = arith.constant dense<0.000000e+00> : vector<256x128xf32>
    %2 = tpu.matmul %0, %1, %cst {dimension_numbers = #tpu.dot_dimension_numbers<[1], [0], [0], [1], [0, 0, 1, 1], [], []>} : vector<256x256xbf16>, vector<256x128xbf16>, vector<256x128xf32> -> vector<256x128xf32>
    %c0_3 = arith.constant 0 : index
    %c0_4 = arith.constant 0 : index
    %3 = vector.load %arg3[%c0_3, %c0_4] : memref<1x128xf32, #tpu.memory_space<vmem>>, vector<1x128xf32>
    %4 = vector.broadcast %3 : vector<1x128xf32> to vector<256x128xf32>
    %5 = arith.addf %2, %4 : vector<256x128xf32>
    %cst_5 = arith.constant 0.000000e+00 : f32
    %6 = vector.broadcast %cst_5 : f32 to vector<256x128xf32>
    %7 = arith.maximumf %5, %6 : vector<256x128xf32>
    %8 = arith.truncf %7 : vector<256x128xf32> to vector<256x128xbf16>
    %c0_6 = arith.constant 0 : index
    %c0_7 = arith.constant 0 : index
    %9 = vector.load %arg4[%c0_6, %c0_7] : memref<128x128xbf16, #tpu.memory_space<vmem>>, vector<128x128xbf16>
    %cst_8 = arith.constant dense<0.000000e+00> : vector<256x128xf32>
    %10 = tpu.matmul %8, %9, %cst_8 {dimension_numbers = #tpu.dot_dimension_numbers<[1], [0], [0], [1], [0, 0, 1, 1], [], []>} : vector<256x128xbf16>, vector<128x128xbf16>, vector<256x128xf32> -> vector<256x128xf32>
    %c0_9 = arith.constant 0 : index
    %c0_10 = arith.constant 0 : index
    %11 = vector.load %arg1[%c0_9, %c0_10] : memref<256x256xbf16, #tpu.memory_space<vmem>>, vector<256x256xbf16>
    %12 = arith.truncf %10 : vector<256x128xf32> to vector<256x128xbf16>
    %cst_11 = arith.constant dense<0.000000e+00> : vector<256x128xf32>
    %13 = tpu.matmul %11, %12, %cst_11 {dimension_numbers = #tpu.dot_dimension_numbers<[1], [0], [0], [1], [0, 0, 1, 1], [], []>} : vector<256x256xbf16>, vector<256x128xbf16>, vector<256x128xf32> -> vector<256x128xf32>
    %c0_12 = arith.constant 0 : index
    %c0_13 = arith.constant 0 : index
    %14 = vector.load %arg5[%c0_12, %c0_13] : memref<1x128xf32, #tpu.memory_space<vmem>>, vector<1x128xf32>
    %15 = vector.broadcast %14 : vector<1x128xf32> to vector<256x128xf32>
    %16 = arith.addf %13, %15 : vector<256x128xf32>
    %cst_14 = arith.constant 0.000000e+00 : f32
    %17 = vector.broadcast %cst_14 : f32 to vector<256x128xf32>
    %18 = arith.maximumf %16, %17 : vector<256x128xf32>
    %19 = arith.truncf %18 : vector<256x128xf32> to vector<256x128xbf16>
    %c0_15 = arith.constant 0 : index
    %c0_16 = arith.constant 0 : index
    %20 = vector.load %arg6[%c0_15, %c0_16] : memref<128x128xbf16, #tpu.memory_space<vmem>>, vector<128x128xbf16>
    %cst_17 = arith.constant dense<0.000000e+00> : vector<256x128xf32>
    %21 = tpu.matmul %19, %20, %cst_17 {dimension_numbers = #tpu.dot_dimension_numbers<[1], [0], [0], [1], [0, 0, 1, 1], [], []>} : vector<256x128xbf16>, vector<128x128xbf16>, vector<256x128xf32> -> vector<256x128xf32>
    %c0_18 = arith.constant 0 : index
    %c0_19 = arith.constant 0 : index
    %22 = vector.load %arg7[%c0_18, %c0_19] : memref<1x128xf32, #tpu.memory_space<vmem>>, vector<1x128xf32>
    %23 = vector.broadcast %22 : vector<1x128xf32> to vector<256x128xf32>
    %24 = arith.addf %21, %23 : vector<256x128xf32>
    %25 = arith.truncf %24 : vector<256x128xf32> to vector<256x128xbf16>
    %c0_20 = arith.constant 0 : index
    %c0_21 = arith.constant 0 : index
    %26 = vector.load %arg8[%c0_20, %c0_21] : memref<256x128xbf16, #tpu.memory_space<vmem>>, vector<256x128xbf16>
    tpu.vector_store %arg8[%c0_20, %c0_21], %25 {strides = array<i32>} : memref<256x128xbf16, #tpu.memory_space<vmem>>, vector<256x128xbf16>,
    return
  }
  func.func @transform_0(%arg0: i32) -> (i32, i32) {
    %c0_i32 = arith.constant 0 : i32
    %c0_i32_0 = arith.constant 0 : i32
    %c0_i32_1 = arith.constant 0 : i32
    return %c0_i32, %c0_i32_0 : i32, i32
  }
  func.func @transform_1(%arg0: i32) -> (i32, i32) {
    %c0_i32 = arith.constant 0 : i32
    %c0_i32_0 = arith.constant 0 : i32
    %c0_i32_1 = arith.constant 0 : i32
    return %c0_i32, %c0_i32_0 : i32, i32
  }
  func.func @transform_2(%arg0: i32) -> (i32, i32) {
    %c0_i32 = arith.constant 0 : i32
    %c0_i32_0 = arith.constant 0 : i32
    %c0_i32_1 = arith.constant 0 : i32
    return %c0_i32, %c0_i32_0 : i32, i32
  }
  func.func @transform_3(%arg0: i32) -> (i32, i32) {
    %c0_i32 = arith.constant 0 : i32
    %c0_i32_0 = arith.constant 0 : i32
    %c0_i32_1 = arith.constant 0 : i32
    return %c0_i32, %c0_i32_0 : i32, i32
  }
  func.func @transform_4(%arg0: i32) -> (i32, i32) {
    %c0_i32 = arith.constant 0 : i32
    %c0_i32_0 = arith.constant 0 : i32
    %c0_i32_1 = arith.constant 0 : i32
    return %c0_i32, %c0_i32_0 : i32, i32
  }
  func.func @transform_5(%arg0: i32) -> (i32, i32) {
    %c0_i32 = arith.constant 0 : i32
    %c0_i32_0 = arith.constant 0 : i32
    %c0_i32_1 = arith.constant 0 : i32
    return %c0_i32, %c0_i32_0 : i32, i32
  }
  func.func @transform_6(%arg0: i32) -> (i32, i32) {
    %c0_i32 = arith.constant 0 : i32
    %c0_i32_0 = arith.constant 0 : i32
    %c0_i32_1 = arith.constant 0 : i32
    return %c0_i32, %c0_i32_0 : i32, i32
  }
  func.func @transform_7(%arg0: i32) -> (i32, i32) {
    %c0_i32 = arith.constant 0 : i32
    %c0_i32_0 = arith.constant 0 : i32
    %c0_i32_1 = arith.constant 0 : i32
    return %c0_i32, %c0_i32_0 : i32, i32
  }
}

</mosaic_0001>

<bundles_post_ra>
// kernel: gcn_forward.1
= control target key start
LH: loop header
LB: loop body
LE: loop exit
PB: predicated region body
PF: predicated region fallthrough
CT: control target
= control target key end

     0   :  { %s2609_s1 = inlined_call_operand.vmem [shape: bf16[256,128], index: 1, kind: input, shape index: {}]   ;;  %s2610_s0 = inlined_call_operand.vmem [shape: bf16[256,256], index: 0, kind: input, shape index: {}]   ;;  %s2611_s3 = inlined_call_operand.vmem [shape: bf16[128,128], index: 3, kind: input, shape index: {}]   ;;  %s2612_s2 = inlined_call_operand.vmem [shape: f32[1,128], index: 2, kind: input, shape index: {}]   ;;  %s2613_s5 = inlined_call_operand.vmem [shape: bf16[128,128], index: 5, kind: input, shape index: {}]   ;;  %s2614_s4 = inlined_call_operand.vmem [shape: f32[1,128], index: 4, kind: input, shape index: {}]   ;;  %s2615_s6 = inlined_call_operand.vmem [shape: f32[1,128], index: 6, kind: input, shape index: {}]   ;;  %s2616_s7 = inlined_call_operand.vmem [shape: bf16[256,128], index: 7, kind: output, shape index: {}]  }
   0x1   :  { %v2010_v0 = vld [vmem:[%s2609_s1 + $0x40] sm:$0xff]   ;;  %v2012_v2 = vld [vmem:[%s2609_s1 + $0x48] sm:$0xff]   ;;  %v2014_v4 = vld [vmem:[%s2609_s1 + $0x50] sm:$0xff]  }
   0x2   :  { %v2011_v1 = vld [vmem:[%s2609_s1] sm:$0xff]   ;;  %1642 = vmatprep.subr.bf16.mxu0 %v2010_v0  ;;  %v2013_v3 = vld [vmem:[%s2609_s1 + $0x8] sm:$0xff]   ;;  %v2015_v5 = vld [vmem:[%s2609_s1 + $0x10] sm:$0xff]  }
   0x3   :  { %1643 = vmatpush3.bf16.msra.mxu0 %v2011_v1  ;;  %v2016_v6 = vld [vmem:[%s2609_s1 + $0x58] sm:$0xff]   ;;  %v2018_v8 = vld [vmem:[%s2609_s1 + $0x60] sm:$0xff]   ;;  %v2020_v10 = vld [vmem:[%s2609_s1 + $0x68] sm:$0xff]  }
   0x4   :  { %1644 = vmatprep.subr.bf16.mxu0 %v2012_v2  ;;  %v2017_v7 = vld [vmem:[%s2609_s1 + $0x18] sm:$0xff]   ;;  %v2019_v9 = vld [vmem:[%s2609_s1 + $0x20] sm:$0xff]   ;;  %v2021_v12 = vld [vmem:[%s2609_s1 + $0x28] sm:$0xff]  }
   0x5   :  { %v2166_v11 = vld [vmem:[%s2610_s0 + $0x4] ss:$8 sps:$4 sm:$0xff]   ;;  %v2022_v13 = vld [vmem:[%s2609_s1 + $0x70] sm:$0xff]   ;;  %v2024_v15 = vld [vmem:[%s2609_s1 + $0x78] sm:$0xff]  }
   0x6   :  { %386 = vmatprep.mubr.bf16.mxu0 %v2166_v11  ;;  %v2023_v14 = vld [vmem:[%s2609_s1 + $0x30] sm:$0xff]   ;;  %v2025_v16 = vld [vmem:[%s2609_s1 + $0x38] sm:$0xff]   ;;  %v2187_v17 = vld [vmem:[%s2610_s0] ss:$8 sps:$4 sm:$0xff]  }
   0x7   :  { %1645 = vmatpush3.bf16.msra.mxu0 %v2013_v3  ;;  %v2192_v18 = vld [vmem:[%s2610_s0 + $0x14] ss:$8 sps:$4 sm:$0xff]   ;;  %v2199_v19 = vld [vmem:[%s2610_s0 + $0x10] ss:$8 sps:$4 sm:$0xff]   ;;  %v2204_v20 = vld [vmem:[%s2610_s0 + $0x24] ss:$8 sps:$4 sm:$0xff]  }
   0x8   :  { %1646 = vmatprep.subr.bf16.mxu0 %v2014_v4  ;;  %v2074_v21 = vld [vmem:[%s2611_s3] sm:$0xff]   ;;  %v2075_v22 = vld [vmem:[%s2611_s3 + $0x8] sm:$0xff]   ;;  %v2076_v23 = vld [vmem:[%s2611_s3 + $0x10] sm:$0xff]  }
   0x9   :  { %1914 = vmatprep.subr.bf16.mxu1 %v2074_v21  ;;  %v2220_v24 = vld [vmem:[%s2610_s0 + $0x20] ss:$8 sps:$4 sm:$0xff]   ;;  %v2225_v25 = vld [vmem:[%s2610_s0 + $0x34] ss:$8 sps:$4 sm:$0xff]   ;;  %v2232_v26 = vld [vmem:[%s2610_s0 + $0x30] ss:$8 sps:$4 sm:$0xff]  }
   0xa   :  { %1915 = vmatpush3.bf16.msra.mxu1 %v2074_v21  ;;  %v2237_v27 = vld [vmem:[%s2610_s0 + $0x44] ss:$8 sps:$4 sm:$0xff]   ;;  %v2244_v28 = vld [vmem:[%s2610_s0 + $0x40] ss:$8 sps:$4 sm:$0xff]   ;;  %v2249_v29 = vld [vmem:[%s2610_s0 + $0x54] ss:$8 sps:$4 sm:$0xff]  }
   0xb   :  { %1647 = vmatpush3.bf16.msra.mxu0 %v2015_v5  ;;  %1916 = vmatprep.subr.bf16.mxu1 %v2075_v22  ;;  %v2256_v30 = vld [vmem:[%s2610_s0 + $0x50] ss:$8 sps:$4 sm:$0xff]   ;;  %v2261_v31 = vld [vmem:[%s2610_s0 + $0x64] ss:$8 sps:$4 sm:$0xff]   ;;  %v2268_v32 = vld [vmem:[%s2610_s0 + $0x60] ss:$8 sps:$4 sm:$0xff]  }
   0xc   :  { %1648 = vmatprep.subr.bf16.mxu0 %v2016_v6  ;;  %v2273_v33 = vld [vmem:[%s2610_s0 + $0x74] ss:$8 sps:$4 sm:$0xff]   ;;  %v2280_v34 = vld [vmem:[%s2610_s0 + $0x70] ss:$8 sps:$4 sm:$0xff]   ;;  %v2285_v35 = vld [vmem:[%s2610_s0 + $0x84] ss:$8 sps:$4 sm:$0xff]  }
   0xd   :  { %v2292_v36 = vld [vmem:[%s2610_s0 + $0x80] ss:$8 sps:$4 sm:$0xff]   ;;  %v2297_v37 = vld [vmem:[%s2610_s0 + $0x94] ss:$8 sps:$4 sm:$0xff]   ;;  %v2304_v38 = vld [vmem:[%s2610_s0 + $0x90] ss:$8 sps:$4 sm:$0xff]  }
   0xe   :  { %1917 = vmatpush3.bf16.msra.mxu1 %v2075_v22  ;;  %v2309_v39 = vld [vmem:[%s2610_s0 + $0xa4] ss:$8 sps:$4 sm:$0xff]   ;;  %v2316_v40 = vld [vmem:[%s2610_s0 + $0xa0] ss:$8 sps:$4 sm:$0xff]   ;;  %v2321_v41 = vld [vmem:[%s2610_s0 + $0xb4] ss:$8 sps:$4 sm:$0xff]  }
   0xf   :  { %1649 = vmatpush3.bf16.msra.mxu0 %v2017_v7  ;;  %1918 = vmatprep.subr.bf16.mxu1 %v2076_v23  ;;  %v2077_v42 = vld [vmem:[%s2611_s3 + $0x18] sm:$0xff]   ;;  %v2336_v44 = vld [vmem:[%s2610_s0 + $0xc4] ss:$8 sps:$4 sm:$0xff]   ;;  %v2349_v47 = vld [vmem:[%s2610_s0 + $0xc0] ss:$8 sps:$4 sm:$0xff]  }
  0x10   :  { %1650 = vmatprep.subr.bf16.mxu0 %v2018_v8  ;;  %v2331_v43 = vld [vmem:[%s2610_s0 + $0xb0] ss:$8 sps:$4 sm:$0xff]   ;;  %v2078_v45 = vld [vmem:[%s2611_s3 + $0x20] sm:$0xff]   ;;  %v2079_v46 = vld [vmem:[%s2611_s3 + $0x28] sm:$0xff]  }
  0x11   :  { %v2354_v48 = vld [vmem:[%s2610_s0 + $0xd4] ss:$8 sps:$4 sm:$0xff]   ;;  %v2367_v51 = vld [vmem:[%s2610_s0 + $0xd0] ss:$8 sps:$4 sm:$0xff]   ;;  %v2372_v52 = vld [vmem:[%s2610_s0 + $0xe4] ss:$8 sps:$4 sm:$0xff]  }
  0x12   :  { %1919 = vmatpush3.bf16.msra.mxu1 %v2076_v23  ;;  %v2080_v49 = vld [vmem:[%s2611_s3 + $0x30] sm:$0xff]   ;;  %v2081_v50 = vld [vmem:[%s2611_s3 + $0x38] sm:$0xff]   ;;  %v2379_v53 = vld [vmem:[%s2610_s0 + $0xe0] ss:$8 sps:$4 sm:$0xff]  }
  0x13   :  { %1651 = vmatpush3.bf16.msra.mxu0 %v2019_v9  ;;  %1920 = vmatprep.subr.bf16.mxu1 %v2077_v42  ;;  %v2384_v54 = vld [vmem:[%s2610_s0 + $0xf4] ss:$8 sps:$4 sm:$0xff]   ;;  %v2391_v55 = vld [vmem:[%s2610_s0 + $0xf0] ss:$8 sps:$4 sm:$0xff]   ;;  %v2397_v58 = vld [vmem:[%s2612_s2] ss:$0 sm:$0xff] }
  0x14   :  { %1652 = vmatprep.subr.bf16.mxu0 %v2020_v10 }
  0x16   :  { %1921 = vmatpush3.bf16.msra.mxu1 %v2077_v42 }
  0x17   :  { %1653 = vmatpush3.bf16.msra.mxu0 %v2021_v12  ;;  %1922 = vmatprep.subr.bf16.mxu1 %v2078_v45 }
  0x18   :  { %1654 = vmatprep.subr.bf16.mxu0 %v2022_v13 }
  0x1a   :  { %1923 = vmatpush3.bf16.msra.mxu1 %v2078_v45 }
  0x1b   :  { %1655 = vmatpush3.bf16.msra.mxu0 %v2023_v14  ;;  %1924 = vmatprep.subr.bf16.mxu1 %v2079_v46 }
  0x1c   :  { %1656 = vmatprep.subr.bf16.mxu0 %v2024_v15 }
  0x1e   :  { %1925 = vmatpush3.bf16.msra.mxu1 %v2079_v46 }
  0x1f   :  { %1657 = vmatpush3.bf16.msra.mxu0 %v2025_v16  ;;  %1926 = vmatprep.subr.bf16.mxu1 %v2080_v49 }
  0x22   :  { %387 = vmatmul.mubr.bf16.vlgmr.msra.gmra.mrb[0].mxu0 %v2187_v17  ;;  %1927 = vmatpush3.bf16.msra.mxu1 %v2080_v49 }
  0x23   :  { %394 = vmatprep.mubr.bf16.mxu0 %v2192_v18  ;;  %1928 = vmatprep.subr.bf16.mxu1 %v2081_v50 }
  0x26   :  { %1929 = vmatpush3.bf16.msra.mxu1 %v2081_v50 }
  0x2a   :  { %395 = vmatmul.mubr.bf16.gmra.mrb[4].mxu0 %v2199_v19 }
  0x2b   :  { %402 = vmatprep.mubr.bf16.mxu0 %v2204_v20 }
  0x32   :  { %403 = vmatmul.mubr.bf16.gmra.mrb[8].mxu0 %v2220_v24 }
  0x33   :  { %410 = vmatprep.mubr.bf16.mxu0 %v2225_v25 }
  0x3a   :  { %411 = vmatmul.mubr.bf16.gmra.mrb[12].mxu0 %v2232_v26 }
  0x3b   :  { %418 = vmatprep.mubr.bf16.mxu0 %v2237_v27 }
  0x42   :  { %419 = vmatmul.mubr.bf16.gmra.mrb[16].mxu0 %v2244_v28 }
  0x43   :  { %426 = vmatprep.mubr.bf16.mxu0 %v2249_v29 }
  0x4a   :  { %427 = vmatmul.mubr.bf16.gmra.mrb[20].mxu0 %v2256_v30 }
  0x4b   :  { %434 = vmatprep.mubr.bf16.mxu0 %v2261_v31 }
  0x52   :  { %435 = vmatmul.mubr.bf16.gmra.mrb[24].mxu0 %v2268_v32 }
  0x53   :  { %442 = vmatprep.mubr.bf16.mxu0 %v2273_v33 }
  0x5a   :  { %443 = vmatmul.mubr.bf16.gmra.mrb[28].mxu0 %v2280_v34 }
  0x5b   :  { %450 = vmatprep.mubr.bf16.mxu0 %v2285_v35 }
  0x62   :  { %451 = vmatmul.mubr.bf16.gmra.mrb[32].mxu0 %v2292_v36 }
  0x63   :  { %458 = vmatprep.mubr.bf16.mxu0 %v2297_v37 }
  0x6a   :  { %459 = vmatmul.mubr.bf16.gmra.mrb[36].mxu0 %v2304_v38 }
  0x6b   :  { %466 = vmatprep.mubr.bf16.mxu0 %v2309_v39 }
  0x72   :  { %467 = vmatmul.mubr.bf16.gmra.mrb[40].mxu0 %v2316_v40 }
  0x73   :  { %474 = vmatprep.mubr.bf16.mxu0 %v2321_v41 }
  0x7a   :  { %475 = vmatmul.mubr.bf16.gmra.mrb[44].mxu0 %v2331_v43 }
  0x7b   :  { %482 = vmatprep.mubr.bf16.mxu0 %v2336_v44 }
  0x82   :  { %483 = vmatmul.mubr.bf16.gmra.mrb[48].mxu0 %v2349_v47 }
  0x83   :  { %490 = vmatprep.mubr.bf16.mxu0 %v2354_v48 }
  0x8a   :  { %491 = vmatmul.mubr.bf16.gmra.mrb[52].mxu0 %v2367_v51 }
  0x8b   :  { %498 = vmatprep.mubr.bf16.mxu0 %v2372_v52 }
  0x92   :  { %499 = vmatmul.mubr.bf16.gmra.mrb[56].mxu0 %v2379_v53 }
  0x93   :  { %506 = vmatprep.mubr.bf16.mxu0 %v2384_v54 }
  0x9a   :  { %507 = vmatmul.mubr.bf16.gmra.mrb[60].mxu0 %v2391_v55 }
  0xf5   :  { %v1658_v56 = vpop.f32.mrb[0].mxu0 }
  0xf6   :  { %v1659_v57 = vpop.f32.mrb[1].mxu0 }
  0xf7   :  { %v1660_v59 = vadd.f32 %v1659_v57, %v1658_v56  ;;  %v1661_v60 = vpop.f32.mrb[2].mxu0 }
  0xf8   :  { %v1662_v61 = vpop.f32.mrb[3].mxu0 }
  0xf9   :  { %v1663_v62 = vadd.f32 %v1662_v61, %v1661_v60  ;;  %v389_v63 = vadd.f32 %v1660_v59, %v2397_v58 }
  0xfb   :  { %v392_v0 = vadd.f32 %v1663_v62, %v2397_v58  ;;  %v515_v2 = vmax.f32 %v389_v63, 0.0 }
  0xfd   :  { %v1664_v1 = vpop.f32.mrb[4].mxu0  ;;  %v516_v3 = vmax.f32 %v392_v0, 0.0 }
  0xfe   :  { %v1665_v4 = vpop.f32.mrb[5].mxu0 }
  0xff   :  { %v1666_v5 = vadd.f32 %v1665_v4, %v1664_v1  ;;  %v1667_v6 = vpop.f32.mrb[6].mxu0  ;;  %v547_v7 = vpack.c.bf16 %v516_v3, %v515_v2 }
 0x100   :  { %v1668_v8 = vpop.f32.mrb[7].mxu0 }
 0x101   :  { %v397_v9 = vadd.f32 %v1666_v5, %v2397_v58  ;;  %v1669_v10 = vadd.f32 %v1668_v8, %v1667_v6  ;;  %1930 = vmatprep.mubr.bf16.mxu1 %v547_v7 }
 0x103   :  { %v400_v12 = vadd.f32 %v1669_v10, %v2397_v58  ;;  %v517_v13 = vmax.f32 %v397_v9, 0.0 }
 0x105   :  { %v518_v14 = vmax.f32 %v400_v12, 0.0  ;;  %v1670_v15 = vpop.f32.mrb[8].mxu0 }
 0x106   :  { %v1671_v16 = vpop.f32.mrb[9].mxu0 }
 0x107   :  { %v1672_v21 = vadd.f32 %v1671_v16, %v1670_v15  ;;  %v1673_v22 = vpop.f32.mrb[10].mxu0  ;;  %v548_v23 = vpack.c.bf16 %v518_v14, %v517_v13 }
 0x108   :  { %v1674_v42 = vpop.f32.mrb[11].mxu0 }
 0x109   :  { %v405_v45 = vadd.f32 %v1672_v21, %v2397_v58  ;;  %v1675_v46 = vadd.f32 %v1674_v42, %v1673_v22  ;;  %1931 = vmatmul.mubr.bf16.vlgmr.msra.gmra.mrb[0].mxu1 %v548_v23 }
 0x10b   :  { %v408_v49 = vadd.f32 %v1675_v46, %v2397_v58  ;;  %v519_v50 = vmax.f32 %v405_v45, 0.0 }
 0x10d   :  { %v520_v56 = vmax.f32 %v408_v49, 0.0  ;;  %v1676_v57 = vpop.f32.mrb[12].mxu0 }
 0x10e   :  { %v1677_v59 = vpop.f32.mrb[13].mxu0 }
 0x10f   :  { %v1678_v60 = vadd.f32 %v1677_v59, %v1676_v57  ;;  %v1679_v61 = vpop.f32.mrb[14].mxu0  ;;  %v549_v62 = vpack.c.bf16 %v520_v56, %v519_v50 }
 0x110   :  { %v1680_v63 = vpop.f32.mrb[15].mxu0 }
 0x111   :  { %v413_v0 = vadd.f32 %v1678_v60, %v2397_v58  ;;  %v1681_v1 = vadd.f32 %v1680_v63, %v1679_v61  ;;  %1934 = vmatprep.mubr.bf16.mxu1 %v549_v62 }
 0x113   :  { %v416_v2 = vadd.f32 %v1681_v1, %v2397_v58  ;;  %v521_v3 = vmax.f32 %v413_v0, 0.0 }
 0x115   :  { %v522_v4 = vmax.f32 %v416_v2, 0.0  ;;  %v1682_v5 = vpop.f32.mrb[16].mxu0 }
 0x116   :  { %v1683_v6 = vpop.f32.mrb[17].mxu0 }
 0x117   :  { %v1684_v7 = vadd.f32 %v1683_v6, %v1682_v5  ;;  %v1685_v8 = vpop.f32.mrb[18].mxu0  ;;  %v550_v9 = vpack.c.bf16 %v522_v4, %v521_v3 }
 0x118   :  { %v1686_v10 = vpop.f32.mrb[19].mxu0 }
 0x119   :  { %v421_v12 = vadd.f32 %v1684_v7, %v2397_v58  ;;  %v1687_v13 = vadd.f32 %v1686_v10, %v1685_v8  ;;  %1935 = vmatmul.mubr.bf16.gmra.mrb[4].mxu1 %v550_v9 }
 0x11b   :  { %v424_v14 = vadd.f32 %v1687_v13, %v2397_v58  ;;  %v523_v15 = vmax.f32 %v421_v12, 0.0 }
 0x11d   :  { %v524_v16 = vmax.f32 %v424_v14, 0.0  ;;  %v1688_v21 = vpop.f32.mrb[20].mxu0 }
 0x11e   :  { %v1689_v22 = vpop.f32.mrb[21].mxu0 }
 0x11f   :  { %v1690_v23 = vadd.f32 %v1689_v22, %v1688_v21  ;;  %v1691_v42 = vpop.f32.mrb[22].mxu0  ;;  %v551_v45 = vpack.c.bf16 %v524_v16, %v523_v15 }
 0x120   :  { %v1692_v46 = vpop.f32.mrb[23].mxu0 }
 0x121   :  { %v429_v49 = vadd.f32 %v1690_v23, %v2397_v58  ;;  %v1693_v50 = vadd.f32 %v1692_v46, %v1691_v42  ;;  %1938 = vmatprep.mubr.bf16.mxu1 %v551_v45 }
 0x123   :  { %v432_v56 = vadd.f32 %v1693_v50, %v2397_v58  ;;  %v525_v57 = vmax.f32 %v429_v49, 0.0 }
 0x125   :  { %v526_v59 = vmax.f32 %v432_v56, 0.0  ;;  %v1694_v60 = vpop.f32.mrb[24].mxu0 }
 0x126   :  { %v1695_v61 = vpop.f32.mrb[25].mxu0 }
 0x127   :  { %v1696_v62 = vadd.f32 %v1695_v61, %v1694_v60  ;;  %v1697_v63 = vpop.f32.mrb[26].mxu0  ;;  %v552_v0 = vpack.c.bf16 %v526_v59, %v525_v57 }
 0x128   :  { %v1698_v1 = vpop.f32.mrb[27].mxu0 }
 0x129   :  { %v437_v2 = vadd.f32 %v1696_v62, %v2397_v58  ;;  %v1699_v3 = vadd.f32 %v1698_v1, %v1697_v63  ;;  %1939 = vmatmul.mubr.bf16.gmra.mrb[8].mxu1 %v552_v0 }
 0x12b   :  { %v440_v4 = vadd.f32 %v1699_v3, %v2397_v58  ;;  %v527_v5 = vmax.f32 %v437_v2, 0.0 }
 0x12d   :  { %v528_v6 = vmax.f32 %v440_v4, 0.0  ;;  %v1700_v7 = vpop.f32.mrb[28].mxu0 }
 0x12e   :  { %v1701_v8 = vpop.f32.mrb[29].mxu0 }
 0x12f   :  { %v1702_v9 = vadd.f32 %v1701_v8, %v1700_v7  ;;  %v1703_v10 = vpop.f32.mrb[30].mxu0  ;;  %v553_v12 = vpack.c.bf16 %v528_v6, %v527_v5 }
 0x130   :  { %v1704_v13 = vpop.f32.mrb[31].mxu0 }
 0x131   :  { %v445_v14 = vadd.f32 %v1702_v9, %v2397_v58  ;;  %v1705_v15 = vadd.f32 %v1704_v13, %v1703_v10  ;;  %1942 = vmatprep.mubr.bf16.mxu1 %v553_v12 }
 0x133   :  { %v448_v16 = vadd.f32 %v1705_v15, %v2397_v58  ;;  %v529_v21 = vmax.f32 %v445_v14, 0.0 }
 0x135   :  { %v530_v22 = vmax.f32 %v448_v16, 0.0  ;;  %v1706_v23 = vpop.f32.mrb[32].mxu0 }
 0x136   :  { %v1707_v42 = vpop.f32.mrb[33].mxu0 }
 0x137   :  { %v1708_v45 = vadd.f32 %v1707_v42, %v1706_v23  ;;  %v1709_v46 = vpop.f32.mrb[34].mxu0  ;;  %v554_v49 = vpack.c.bf16 %v530_v22, %v529_v21 }
 0x138   :  { %v1710_v50 = vpop.f32.mrb[35].mxu0 }
 0x139   :  { %v453_v56 = vadd.f32 %v1708_v45, %v2397_v58  ;;  %v1711_v57 = vadd.f32 %v1710_v50, %v1709_v46  ;;  %1943 = vmatmul.mubr.bf16.gmra.mrb[12].mxu1 %v554_v49 }
 0x13b   :  { %v456_v59 = vadd.f32 %v1711_v57, %v2397_v58  ;;  %v531_v60 = vmax.f32 %v453_v56, 0.0 }
 0x13d   :  { %v532_v61 = vmax.f32 %v456_v59, 0.0  ;;  %v1712_v62 = vpop.f32.mrb[36].mxu0 }
 0x13e   :  { %v1713_v63 = vpop.f32.mrb[37].mxu0 }
 0x13f   :  { %v1714_v0 = vadd.f32 %v1713_v63, %v1712_v62  ;;  %v1715_v1 = vpop.f32.mrb[38].mxu0  ;;  %v555_v2 = vpack.c.bf16 %v532_v61, %v531_v60 }
 0x140   :  { %v1716_v3 = vpop.f32.mrb[39].mxu0 }
 0x141   :  { %v461_v4 = vadd.f32 %v1714_v0, %v2397_v58  ;;  %v1717_v5 = vadd.f32 %v1716_v3, %v1715_v1  ;;  %1946 = vmatprep.mubr.bf16.mxu1 %v555_v2 }
 0x143   :  { %v464_v6 = vadd.f32 %v1717_v5, %v2397_v58  ;;  %v533_v7 = vmax.f32 %v461_v4, 0.0 }
 0x145   :  { %v534_v8 = vmax.f32 %v464_v6, 0.0  ;;  %v1718_v9 = vpop.f32.mrb[40].mxu0 }
 0x146   :  { %v1719_v10 = vpop.f32.mrb[41].mxu0 }
 0x147   :  { %v1720_v12 = vadd.f32 %v1719_v10, %v1718_v9  ;;  %v1721_v13 = vpop.f32.mrb[42].mxu0  ;;  %v556_v14 = vpack.c.bf16 %v534_v8, %v533_v7 }
 0x148   :  { %v1722_v15 = vpop.f32.mrb[43].mxu0 }
 0x149   :  { %v469_v16 = vadd.f32 %v1720_v12, %v2397_v58  ;;  %v1723_v21 = vadd.f32 %v1722_v15, %v1721_v13  ;;  %1947 = vmatmul.mubr.bf16.gmra.mrb[16].mxu1 %v556_v14 }
 0x14b   :  { %v472_v22 = vadd.f32 %v1723_v21, %v2397_v58  ;;  %v535_v23 = vmax.f32 %v469_v16, 0.0 }
 0x14d   :  { %v536_v42 = vmax.f32 %v472_v22, 0.0  ;;  %v1724_v45 = vpop.f32.mrb[44].mxu0 }
 0x14e   :  { %v1725_v46 = vpop.f32.mrb[45].mxu0 }
 0x14f   :  { %v1726_v49 = vadd.f32 %v1725_v46, %v1724_v45  ;;  %v1727_v50 = vpop.f32.mrb[46].mxu0  ;;  %v557_v56 = vpack.c.bf16 %v536_v42, %v535_v23 }
 0x150   :  { %v1728_v57 = vpop.f32.mrb[47].mxu0 }
 0x151   :  { %v477_v59 = vadd.f32 %v1726_v49, %v2397_v58  ;;  %v1729_v60 = vadd.f32 %v1728_v57, %v1727_v50  ;;  %1950 = vmatprep.mubr.bf16.mxu1 %v557_v56 }
 0x153   :  { %v480_v61 = vadd.f32 %v1729_v60, %v2397_v58  ;;  %v537_v62 = vmax.f32 %v477_v59, 0.0 }
 0x155   :  { %v538_v63 = vmax.f32 %v480_v61, 0.0  ;;  %v1730_v0 = vpop.f32.mrb[48].mxu0 }
 0x156   :  { %v1731_v1 = vpop.f32.mrb[49].mxu0 }
 0x157   :  { %v1732_v2 = vadd.f32 %v1731_v1, %v1730_v0  ;;  %v1733_v3 = vpop.f32.mrb[50].mxu0  ;;  %v558_v4 = vpack.c.bf16 %v538_v63, %v537_v62 }
 0x158   :  { %v1734_v5 = vpop.f32.mrb[51].mxu0 }
 0x159   :  { %v485_v6 = vadd.f32 %v1732_v2, %v2397_v58  ;;  %v1735_v7 = vadd.f32 %v1734_v5, %v1733_v3  ;;  %1951 = vmatmul.mubr.bf16.gmra.mrb[20].mxu1 %v558_v4 }
 0x15b   :  { %v488_v8 = vadd.f32 %v1735_v7, %v2397_v58  ;;  %v539_v9 = vmax.f32 %v485_v6, 0.0 }
 0x15d   :  { %v540_v10 = vmax.f32 %v488_v8, 0.0  ;;  %v1736_v12 = vpop.f32.mrb[52].mxu0 }
 0x15e   :  { %v1737_v13 = vpop.f32.mrb[53].mxu0 }
 0x15f   :  { %v1738_v14 = vadd.f32 %v1737_v13, %v1736_v12  ;;  %v1739_v15 = vpop.f32.mrb[54].mxu0  ;;  %v559_v16 = vpack.c.bf16 %v540_v10, %v539_v9 }
 0x160   :  { %v1740_v21 = vpop.f32.mrb[55].mxu0 }
 0x161   :  { %v493_v22 = vadd.f32 %v1738_v14, %v2397_v58  ;;  %v1741_v23 = vadd.f32 %v1740_v21, %v1739_v15  ;;  %1954 = vmatprep.mubr.bf16.mxu1 %v559_v16 }
 0x163   :  { %v496_v42 = vadd.f32 %v1741_v23, %v2397_v58  ;;  %v541_v45 = vmax.f32 %v493_v22, 0.0 }
 0x165   :  { %v542_v46 = vmax.f32 %v496_v42, 0.0  ;;  %v1742_v49 = vpop.f32.mrb[56].mxu0 }
 0x166   :  { %v1743_v50 = vpop.f32.mrb[57].mxu0 }
 0x167   :  { %v1744_v56 = vadd.f32 %v1743_v50, %v1742_v49  ;;  %v1745_v57 = vpop.f32.mrb[58].mxu0  ;;  %v560_v59 = vpack.c.bf16 %v542_v46, %v541_v45 }
 0x168   :  { %v1746_v60 = vpop.f32.mrb[59].mxu0 }
 0x169   :  { %v501_v61 = vadd.f32 %v1744_v56, %v2397_v58  ;;  %v1747_v62 = vadd.f32 %v1746_v60, %v1745_v57  ;;  %1955 = vmatmul.mubr.bf16.gmra.mrb[24].mxu1 %v560_v59 }
 0x16b   :  { %v504_v63 = vadd.f32 %v1747_v62, %v2397_v58  ;;  %v543_v0 = vmax.f32 %v501_v61, 0.0 }
 0x16d   :  { %v544_v1 = vmax.f32 %v504_v63, 0.0  ;;  %v1748_v2 = vpop.f32.mrb[60].mxu0 }
 0x16e   :  { %v1749_v3 = vpop.f32.mrb[61].mxu0 }
 0x16f   :  { %v1750_v4 = vadd.f32 %v1749_v3, %v1748_v2  ;;  %v1751_v5 = vpop.f32.mrb[62].mxu0  ;;  %v561_v6 = vpack.c.bf16 %v544_v1, %v543_v0 }
 0x170   :  { %v1752_v7 = vpop.f32.mrb[63].mxu0 }
 0x171   :  { %v509_v8 = vadd.f32 %v1750_v4, %v2397_v58  ;;  %v1753_v9 = vadd.f32 %v1752_v7, %v1751_v5  ;;  %1958 = vmatprep.mubr.bf16.mxu1 %v561_v6 }
 0x173   :  { %v512_v10 = vadd.f32 %v1753_v9, %v2397_v58  ;;  %v545_v12 = vmax.f32 %v509_v8, 0.0 }
 0x175   :  { %v546_v13 = vmax.f32 %v512_v10, 0.0 }
 0x177   :  { %v562_v14 = vpack.c.bf16 %v546_v13, %v545_v12 }
 0x179   :  { %1959 = vmatmul.mubr.bf16.gmra.mrb[28].mxu1 %v562_v14 }
 0x17a   :  { %843 = vmatprep.mubr.bf16.mxu1 %v2166_v11 }
 0x1dc   :  { %v1932_v15 = vpop.f32.mrb[0].mxu1 }
 0x1dd   :  { %v661_v16 = vpop.f32.mrb[1].mxu1 }
 0x1de   :  { %v1933_v21 = vpop.f32.mrb[2].mxu1 }
 0x1df   :  { %v789_v22 = vpack.c.bf16 %v1933_v21, %v1932_v15  ;;  %v664_v23 = vpop.f32.mrb[3].mxu1 }
 0x1e0   :  { %v788_v42 = vpack.c.bf16 %v664_v23, %v661_v16 }
 0x1ec   :  { %v1936_v45 = vpop.f32.mrb[4].mxu1 }
 0x1ed   :  { %v677_v46 = vpop.f32.mrb[5].mxu1 }
 0x1ee   :  { %v1937_v49 = vpop.f32.mrb[6].mxu1 }
 0x1ef   :  { %v791_v50 = vpack.c.bf16 %v1937_v49, %v1936_v45  ;;  %v680_v56 = vpop.f32.mrb[7].mxu1 }
 0x1f0   :  { %v790_v57 = vpack.c.bf16 %v680_v56, %v677_v46 }
 0x1fc   :  { %v1940_v59 = vpop.f32.mrb[8].mxu1 }
 0x1fd   :  { %v693_v58 = vpop.f32.mrb[9].mxu1 }
 0x1fe   :  { %v1941_v60 = vpop.f32.mrb[10].mxu1 }
 0x1ff   :  { %v793_v61 = vpack.c.bf16 %v1941_v60, %v1940_v59  ;;  %v696_v62 = vpop.f32.mrb[11].mxu1 }
 0x200   :  { %v792_v63 = vpack.c.bf16 %v696_v62, %v693_v58 }
 0x20c   :  { %v1944_v0 = vpop.f32.mrb[12].mxu1 }
 0x20d   :  { %v709_v11 = vpop.f32.mrb[13].mxu1 }
 0x20e   :  { %v1945_v1 = vpop.f32.mrb[14].mxu1 }
 0x20f   :  { %v795_v2 = vpack.c.bf16 %v1945_v1, %v1944_v0  ;;  %v712_v3 = vpop.f32.mrb[15].mxu1 }
 0x210   :  { %v794_v4 = vpack.c.bf16 %v712_v3, %v709_v11 }
 0x21c   :  { %v1948_v5 = vpop.f32.mrb[16].mxu1 }
 0x21d   :  { %v725_v6 = vpop.f32.mrb[17].mxu1 }
 0x21e   :  { %v1949_v7 = vpop.f32.mrb[18].mxu1 }
 0x21f   :  { %v797_v8 = vpack.c.bf16 %v1949_v7, %v1948_v5  ;;  %v728_v9 = vpop.f32.mrb[19].mxu1 }
 0x220   :  { %v796_v10 = vpack.c.bf16 %v728_v9, %v725_v6 }
 0x222   :  { %1778 = vmatprep.subr.bf16.mxu1 %v796_v10 }
 0x223   :  { %1779 = vmatpush3.bf16.msra.mxu1 %v788_v42 }
 0x224   :  { %1780 = vmatprep.subr.bf16.mxu1 %v797_v8 }
 0x227   :  { %1781 = vmatpush3.bf16.msra.mxu1 %v789_v22 }
 0x22c   :  { %v1952_v12 = vpop.f32.mrb[20].mxu1 }
 0x22d   :  { %v741_v13 = vpop.f32.mrb[21].mxu1 }
 0x22e   :  { %v1953_v14 = vpop.f32.mrb[22].mxu1 }
 0x22f   :  { %v799_v15 = vpack.c.bf16 %v1953_v14, %v1952_v12  ;;  %v744_v16 = vpop.f32.mrb[23].mxu1 }
 0x230   :  { %v798_v21 = vpack.c.bf16 %v744_v16, %v741_v13 }
 0x232   :  { %1782 = vmatprep.subr.bf16.mxu1 %v798_v21 }
 0x233   :  { %1783 = vmatpush3.bf16.msra.mxu1 %v790_v57  ;;  %v2083_v57 = vld [vmem:[%s2613_s5 + $0x8] sm:$0xff]  }
 0x234   :  { %1784 = vmatprep.subr.bf16.mxu1 %v799_v15 }
 0x237   :  { %1785 = vmatpush3.bf16.msra.mxu1 %v791_v50  ;;  %v2082_v50 = vld [vmem:[%s2613_s5] sm:$0xff]  }
 0x238   :  { %1962 = vmatprep.subr.bf16.mxu0 %v2082_v50 }
 0x239   :  { %1963 = vmatpush3.bf16.msra.mxu0 %v2082_v50 }
 0x23a   :  { %1964 = vmatprep.subr.bf16.mxu0 %v2083_v57 }
 0x23c   :  { %v1956_v23 = vpop.f32.mrb[24].mxu1 }
 0x23d   :  { %v757_v45 = vpop.f32.mrb[25].mxu1  ;;  %1965 = vmatpush3.bf16.msra.mxu0 %v2083_v57 }
 0x23e   :  { %v1957_v46 = vpop.f32.mrb[26].mxu1 }
 0x23f   :  { %v801_v49 = vpack.c.bf16 %v1957_v46, %v1956_v23  ;;  %v760_v56 = vpop.f32.mrb[27].mxu1 }
 0x240   :  { %v800_v59 = vpack.c.bf16 %v760_v56, %v757_v45 }
 0x242   :  { %1786 = vmatprep.subr.bf16.mxu1 %v800_v59 }
 0x243   :  { %1787 = vmatpush3.bf16.msra.mxu1 %v792_v63  ;;  %v2085_v63 = vld [vmem:[%s2613_s5 + $0x18] sm:$0xff]  }
 0x244   :  { %1788 = vmatprep.subr.bf16.mxu1 %v801_v49 }
 0x247   :  { %1789 = vmatpush3.bf16.msra.mxu1 %v793_v61  ;;  %v2084_v61 = vld [vmem:[%s2613_s5 + $0x10] sm:$0xff]  }
 0x248   :  { %1966 = vmatprep.subr.bf16.mxu0 %v2084_v61 }
 0x249   :  { %1967 = vmatpush3.bf16.msra.mxu0 %v2084_v61 }
 0x24a   :  { %1968 = vmatprep.subr.bf16.mxu0 %v2085_v63 }
 0x24c   :  { %v1960_v22 = vpop.f32.mrb[28].mxu1 }
 0x24d   :  { %v773_v42 = vpop.f32.mrb[29].mxu1  ;;  %1969 = vmatpush3.bf16.msra.mxu0 %v2085_v63 }
 0x24e   :  { %v1961_v58 = vpop.f32.mrb[30].mxu1 }
 0x24f   :  { %v803_v60 = vpack.c.bf16 %v1961_v58, %v1960_v22  ;;  %v776_v62 = vpop.f32.mrb[31].mxu1 }
 0x250   :  { %v802_v0 = vpack.c.bf16 %v776_v62, %v773_v42 }
 0x252   :  { %1790 = vmatprep.subr.bf16.mxu1 %v802_v0 }
 0x253   :  { %1791 = vmatpush3.bf16.msra.mxu1 %v794_v4 }
 0x254   :  { %1792 = vmatprep.subr.bf16.mxu1 %v803_v60 }
 0x257   :  { %1793 = vmatpush3.bf16.msra.mxu1 %v795_v2 }
 0x25a   :  { %844 = vmatmul.mubr.bf16.vlgmr.msra.gmra.mrb[32].mxu1 %v2187_v17  ;;  %v2086_v17 = vld [vmem:[%s2613_s5 + $0x20] sm:$0xff]  }
 0x25b   :  { %851 = vmatprep.mubr.bf16.mxu1 %v2192_v18  ;;  %1970 = vmatprep.subr.bf16.mxu0 %v2086_v17  ;;  %v2087_v18 = vld [vmem:[%s2613_s5 + $0x28] sm:$0xff]  }
 0x25c   :  { %1971 = vmatpush3.bf16.msra.mxu0 %v2086_v17 }
 0x25d   :  { %1972 = vmatprep.subr.bf16.mxu0 %v2087_v18 }
 0x260   :  { %1973 = vmatpush3.bf16.msra.mxu0 %v2087_v18 }
 0x262   :  { %852 = vmatmul.mubr.bf16.gmra.mrb[36].mxu1 %v2199_v19  ;;  %v2088_v19 = vld [vmem:[%s2613_s5 + $0x30] sm:$0xff]  }
 0x263   :  { %859 = vmatprep.mubr.bf16.mxu1 %v2204_v20  ;;  %1974 = vmatprep.subr.bf16.mxu0 %v2088_v19  ;;  %v2089_v20 = vld [vmem:[%s2613_s5 + $0x38] sm:$0xff]  }
 0x264   :  { %1975 = vmatpush3.bf16.msra.mxu0 %v2088_v19 }
 0x265   :  { %1976 = vmatprep.subr.bf16.mxu0 %v2089_v20 }
 0x268   :  { %1977 = vmatpush3.bf16.msra.mxu0 %v2089_v20 }
 0x26a   :  { %860 = vmatmul.mubr.bf16.gmra.mrb[40].mxu1 %v2220_v24 }
 0x26b   :  { %867 = vmatprep.mubr.bf16.mxu1 %v2225_v25  ;;  %v2490_v25 = vld [vmem:[%s2614_s4] ss:$0 sm:$0xff] }
 0x272   :  { %868 = vmatmul.mubr.bf16.gmra.mrb[44].mxu1 %v2232_v26 }
 0x273   :  { %875 = vmatprep.mubr.bf16.mxu1 %v2237_v27 }
 0x27a   :  { %876 = vmatmul.mubr.bf16.gmra.mrb[48].mxu1 %v2244_v28 }
 0x27b   :  { %883 = vmatprep.mubr.bf16.mxu1 %v2249_v29 }
 0x282   :  { %884 = vmatmul.mubr.bf16.gmra.mrb[52].mxu1 %v2256_v30 }
 0x283   :  { %891 = vmatprep.mubr.bf16.mxu1 %v2261_v31 }
 0x28a   :  { %892 = vmatmul.mubr.bf16.gmra.mrb[56].mxu1 %v2268_v32 }
 0x28b   :  { %899 = vmatprep.mubr.bf16.mxu1 %v2273_v33 }
 0x292   :  { %900 = vmatmul.mubr.bf16.gmra.mrb[60].mxu1 %v2280_v34 }
 0x293   :  { %907 = vmatprep.mubr.bf16.mxu1 %v2285_v35 }
 0x29a   :  { %908 = vmatmul.mubr.bf16.gmra.mrb[64].mxu1 %v2292_v36 }
 0x29b   :  { %915 = vmatprep.mubr.bf16.mxu1 %v2297_v37 }
 0x2a2   :  { %916 = vmatmul.mubr.bf16.gmra.mrb[68].mxu1 %v2304_v38 }
 0x2a3   :  { %923 = vmatprep.mubr.bf16.mxu1 %v2309_v39 }
 0x2aa   :  { %924 = vmatmul.mubr.bf16.gmra.mrb[72].mxu1 %v2316_v40 }
 0x2ab   :  { %931 = vmatprep.mubr.bf16.mxu1 %v2321_v41 }
 0x2b2   :  { %932 = vmatmul.mubr.bf16.gmra.mrb[76].mxu1 %v2331_v43 }
 0x2b3   :  { %939 = vmatprep.mubr.bf16.mxu1 %v2336_v44 }
 0x2ba   :  { %940 = vmatmul.mubr.bf16.gmra.mrb[80].mxu1 %v2349_v47 }
 0x2bb   :  { %947 = vmatprep.mubr.bf16.mxu1 %v2354_v48 }
 0x2c2   :  { %948 = vmatmul.mubr.bf16.gmra.mrb[84].mxu1 %v2367_v51 }
 0x2c3   :  { %955 = vmatprep.mubr.bf16.mxu1 %v2372_v52 }
 0x2ca   :  { %956 = vmatmul.mubr.bf16.gmra.mrb[88].mxu1 %v2379_v53 }
 0x2cb   :  { %963 = vmatprep.mubr.bf16.mxu1 %v2384_v54 }
 0x2d2   :  { %964 = vmatmul.mubr.bf16.gmra.mrb[92].mxu1 %v2391_v55 }
 0x32d   :  { %v1794_v24 = vpop.f32.mrb[32].mxu1 }
 0x32e   :  { %v1795_v26 = vpop.f32.mrb[33].mxu1 }
 0x32f   :  { %v1796_v27 = vadd.f32 %v1795_v26, %v1794_v24  ;;  %v1797_v28 = vpop.f32.mrb[34].mxu1 }
 0x330   :  { %v1798_v29 = vpop.f32.mrb[35].mxu1 }
 0x331   :  { %v846_v30 = vadd.f32 %v1796_v27, %v2490_v25  ;;  %v1799_v31 = vadd.f32 %v1798_v29, %v1797_v28 }
 0x333   :  { %v849_v32 = vadd.f32 %v1799_v31, %v2490_v25  ;;  %v972_v33 = vmax.f32 %v846_v30, 0.0 }
 0x335   :  { %v973_v34 = vmax.f32 %v849_v32, 0.0  ;;  %v1800_v35 = vpop.f32.mrb[36].mxu1 }
 0x336   :  { %v1801_v36 = vpop.f32.mrb[37].mxu1 }
 0x337   :  { %v1802_v37 = vadd.f32 %v1801_v36, %v1800_v35  ;;  %v1803_v38 = vpop.f32.mrb[38].mxu1  ;;  %v1004_v39 = vpack.c.bf16 %v973_v34, %v972_v33 }
 0x338   :  { %v1804_v40 = vpop.f32.mrb[39].mxu1 }
 0x339   :  { %v854_v41 = vadd.f32 %v1802_v37, %v2490_v25  ;;  %v1805_v43 = vadd.f32 %v1804_v40, %v1803_v38  ;;  %1978 = vmatprep.mubr.bf16.mxu0 %v1004_v39 }
 0x33b   :  { %v857_v44 = vadd.f32 %v1805_v43, %v2490_v25  ;;  %v974_v47 = vmax.f32 %v854_v41, 0.0 }
 0x33d   :  { %v975_v48 = vmax.f32 %v857_v44, 0.0  ;;  %v1806_v51 = vpop.f32.mrb[40].mxu1 }
 0x33e   :  { %v1807_v52 = vpop.f32.mrb[41].mxu1 }
 0x33f   :  { %v1005_v53 = vpack.c.bf16 %v975_v48, %v974_v47  ;;  %v1808_v54 = vadd.f32 %v1807_v52, %v1806_v51  ;;  %v1809_v55 = vpop.f32.mrb[42].mxu1 }
 0x340   :  { %v1810_v11 = vpop.f32.mrb[43].mxu1 }
 0x341   :  { %v862_v1 = vadd.f32 %v1808_v54, %v2490_v25  ;;  %1979 = vmatmul.mubr.bf16.vlgmr.msra.gmra.mrb[64].mxu0 %v1005_v53  ;;  %v1811_v2 = vadd.f32 %v1810_v11, %v1809_v55 }
 0x343   :  { %v865_v3 = vadd.f32 %v1811_v2, %v2490_v25  ;;  %v976_v4 = vmax.f32 %v862_v1, 0.0 }
 0x345   :  { %v977_v5 = vmax.f32 %v865_v3, 0.0  ;;  %v1812_v6 = vpop.f32.mrb[44].mxu1 }
 0x346   :  { %v1813_v7 = vpop.f32.mrb[45].mxu1 }
 0x347   :  { %v1814_v8 = vadd.f32 %v1813_v7, %v1812_v6  ;;  %v1815_v9 = vpop.f32.mrb[46].mxu1  ;;  %v1006_v10 = vpack.c.bf16 %v977_v5, %v976_v4 }
 0x348   :  { %v1816_v12 = vpop.f32.mrb[47].mxu1 }
 0x349   :  { %v870_v13 = vadd.f32 %v1814_v8, %v2490_v25  ;;  %v1817_v14 = vadd.f32 %v1816_v12, %v1815_v9  ;;  %1982 = vmatprep.mubr.bf16.mxu0 %v1006_v10 }
 0x34b   :  { %v873_v15 = vadd.f32 %v1817_v14, %v2490_v25  ;;  %v978_v16 = vmax.f32 %v870_v13, 0.0 }
 0x34d   :  { %v979_v21 = vmax.f32 %v873_v15, 0.0  ;;  %v1818_v23 = vpop.f32.mrb[48].mxu1 }
 0x34e   :  { %v1819_v45 = vpop.f32.mrb[49].mxu1 }
 0x34f   :  { %v1820_v46 = vadd.f32 %v1819_v45, %v1818_v23  ;;  %v1007_v49 = vpack.c.bf16 %v979_v21, %v978_v16  ;;  %v1821_v56 = vpop.f32.mrb[50].mxu1 }
 0x350   :  { %v1822_v59 = vpop.f32.mrb[51].mxu1 }
 0x351   :  { %v878_v22 = vadd.f32 %v1820_v46, %v2490_v25  ;;  %1983 = vmatmul.mubr.bf16.gmra.mrb[68].mxu0 %v1007_v49  ;;  %v1823_v42 = vadd.f32 %v1822_v59, %v1821_v56 }
 0x353   :  { %v881_v58 = vadd.f32 %v1823_v42, %v2490_v25  ;;  %v980_v60 = vmax.f32 %v878_v22, 0.0 }
 0x355   :  { %v981_v62 = vmax.f32 %v881_v58, 0.0  ;;  %v1824_v0 = vpop.f32.mrb[52].mxu1 }
 0x356   :  { %v1825_v50 = vpop.f32.mrb[53].mxu1 }
 0x357   :  { %v1826_v57 = vadd.f32 %v1825_v50, %v1824_v0  ;;  %v1827_v61 = vpop.f32.mrb[54].mxu1  ;;  %v1008_v63 = vpack.c.bf16 %v981_v62, %v980_v60 }
 0x358   :  { %v1828_v17 = vpop.f32.mrb[55].mxu1 }
 0x359   :  { %v886_v18 = vadd.f32 %v1826_v57, %v2490_v25  ;;  %v1829_v19 = vadd.f32 %v1828_v17, %v1827_v61  ;;  %1986 = vmatprep.mubr.bf16.mxu0 %v1008_v63 }
 0x35b   :  { %v889_v20 = vadd.f32 %v1829_v19, %v2490_v25  ;;  %v982_v24 = vmax.f32 %v886_v18, 0.0 }
 0x35d   :  { %v983_v26 = vmax.f32 %v889_v20, 0.0  ;;  %v1830_v27 = vpop.f32.mrb[56].mxu1 }
 0x35e   :  { %v1831_v28 = vpop.f32.mrb[57].mxu1 }
 0x35f   :  { %v1832_v29 = vadd.f32 %v1831_v28, %v1830_v27  ;;  %v1009_v30 = vpack.c.bf16 %v983_v26, %v982_v24  ;;  %v1833_v31 = vpop.f32.mrb[58].mxu1 }
 0x360   :  { %v1834_v32 = vpop.f32.mrb[59].mxu1 }
 0x361   :  { %v894_v33 = vadd.f32 %v1832_v29, %v2490_v25  ;;  %1987 = vmatmul.mubr.bf16.gmra.mrb[72].mxu0 %v1009_v30  ;;  %v1835_v34 = vadd.f32 %v1834_v32, %v1833_v31 }
 0x363   :  { %v897_v35 = vadd.f32 %v1835_v34, %v2490_v25  ;;  %v984_v36 = vmax.f32 %v894_v33, 0.0 }
 0x365   :  { %v985_v37 = vmax.f32 %v897_v35, 0.0  ;;  %v1836_v38 = vpop.f32.mrb[60].mxu1 }
 0x366   :  { %v1837_v39 = vpop.f32.mrb[61].mxu1 }
 0x367   :  { %v1838_v40 = vadd.f32 %v1837_v39, %v1836_v38  ;;  %v1839_v41 = vpop.f32.mrb[62].mxu1  ;;  %v1010_v43 = vpack.c.bf16 %v985_v37, %v984_v36 }
 0x368   :  { %v1840_v44 = vpop.f32.mrb[63].mxu1 }
 0x369   :  { %v902_v47 = vadd.f32 %v1838_v40, %v2490_v25  ;;  %v1841_v48 = vadd.f32 %v1840_v44, %v1839_v41  ;;  %1990 = vmatprep.mubr.bf16.mxu0 %v1010_v43 }
 0x36b   :  { %v905_v51 = vadd.f32 %v1841_v48, %v2490_v25  ;;  %v986_v52 = vmax.f32 %v902_v47, 0.0 }
 0x36d   :  { %v987_v53 = vmax.f32 %v905_v51, 0.0  ;;  %v1842_v54 = vpop.f32.mrb[64].mxu1 }
 0x36e   :  { %v1843_v55 = vpop.f32.mrb[65].mxu1 }
 0x36f   :  { %v1844_v11 = vadd.f32 %v1843_v55, %v1842_v54  ;;  %v1011_v1 = vpack.c.bf16 %v987_v53, %v986_v52  ;;  %v1845_v2 = vpop.f32.mrb[66].mxu1 }
 0x370   :  { %v1846_v3 = vpop.f32.mrb[67].mxu1 }
 0x371   :  { %v910_v4 = vadd.f32 %v1844_v11, %v2490_v25  ;;  %1991 = vmatmul.mubr.bf16.gmra.mrb[76].mxu0 %v1011_v1  ;;  %v1847_v5 = vadd.f32 %v1846_v3, %v1845_v2 }
 0x373   :  { %v913_v6 = vadd.f32 %v1847_v5, %v2490_v25  ;;  %v988_v7 = vmax.f32 %v910_v4, 0.0 }
 0x375   :  { %v989_v8 = vmax.f32 %v913_v6, 0.0  ;;  %v1848_v9 = vpop.f32.mrb[68].mxu1 }
 0x376   :  { %v1849_v10 = vpop.f32.mrb[69].mxu1 }
 0x377   :  { %v1850_v12 = vadd.f32 %v1849_v10, %v1848_v9  ;;  %v1851_v13 = vpop.f32.mrb[70].mxu1  ;;  %v1012_v14 = vpack.c.bf16 %v989_v8, %v988_v7 }
 0x378   :  { %v1852_v15 = vpop.f32.mrb[71].mxu1 }
 0x379   :  { %v918_v16 = vadd.f32 %v1850_v12, %v2490_v25  ;;  %v1853_v21 = vadd.f32 %v1852_v15, %v1851_v13  ;;  %1994 = vmatprep.mubr.bf16.mxu0 %v1012_v14 }
 0x37b   :  { %v921_v23 = vadd.f32 %v1853_v21, %v2490_v25  ;;  %v990_v45 = vmax.f32 %v918_v16, 0.0 }
 0x37d   :  { %v991_v46 = vmax.f32 %v921_v23, 0.0  ;;  %v1854_v49 = vpop.f32.mrb[72].mxu1 }
 0x37e   :  { %v1855_v56 = vpop.f32.mrb[73].mxu1 }
 0x37f   :  { %v1856_v59 = vadd.f32 %v1855_v56, %v1854_v49  ;;  %v1013_v22 = vpack.c.bf16 %v991_v46, %v990_v45  ;;  %v1857_v42 = vpop.f32.mrb[74].mxu1 }
 0x380   :  { %v1858_v58 = vpop.f32.mrb[75].mxu1 }
 0x381   :  { %v926_v60 = vadd.f32 %v1856_v59, %v2490_v25  ;;  %1995 = vmatmul.mubr.bf16.gmra.mrb[80].mxu0 %v1013_v22  ;;  %v1859_v62 = vadd.f32 %v1858_v58, %v1857_v42  ;;  %v2527_v58 = vld [vmem:[%s2615_s6] ss:$0 sm:$0xff] }
 0x383   :  { %v929_v0 = vadd.f32 %v1859_v62, %v2490_v25  ;;  %v992_v50 = vmax.f32 %v926_v60, 0.0 }
 0x385   :  { %v993_v57 = vmax.f32 %v929_v0, 0.0  ;;  %v1860_v61 = vpop.f32.mrb[76].mxu1 }
 0x386   :  { %v1861_v63 = vpop.f32.mrb[77].mxu1 }
 0x387   :  { %v1862_v17 = vadd.f32 %v1861_v63, %v1860_v61  ;;  %v1863_v18 = vpop.f32.mrb[78].mxu1  ;;  %v1014_v19 = vpack.c.bf16 %v993_v57, %v992_v50 }
 0x388   :  { %v1864_v20 = vpop.f32.mrb[79].mxu1 }
 0x389   :  { %v934_v24 = vadd.f32 %v1862_v17, %v2490_v25  ;;  %v1865_v26 = vadd.f32 %v1864_v20, %v1863_v18  ;;  %1998 = vmatprep.mubr.bf16.mxu0 %v1014_v19 }
 0x38b   :  { %v937_v27 = vadd.f32 %v1865_v26, %v2490_v25  ;;  %v994_v28 = vmax.f32 %v934_v24, 0.0 }
 0x38d   :  { %v995_v29 = vmax.f32 %v937_v27, 0.0  ;;  %v1866_v30 = vpop.f32.mrb[80].mxu1 }
 0x38e   :  { %v1867_v31 = vpop.f32.mrb[81].mxu1 }
 0x38f   :  { %v1868_v32 = vadd.f32 %v1867_v31, %v1866_v30  ;;  %v1015_v33 = vpack.c.bf16 %v995_v29, %v994_v28  ;;  %v1869_v34 = vpop.f32.mrb[82].mxu1 }
 0x390   :  { %v1870_v35 = vpop.f32.mrb[83].mxu1 }
 0x391   :  { %v942_v36 = vadd.f32 %v1868_v32, %v2490_v25  ;;  %1999 = vmatmul.mubr.bf16.gmra.mrb[84].mxu0 %v1015_v33  ;;  %v1871_v37 = vadd.f32 %v1870_v35, %v1869_v34 }
 0x393   :  { %v945_v38 = vadd.f32 %v1871_v37, %v2490_v25  ;;  %v996_v39 = vmax.f32 %v942_v36, 0.0 }
 0x395   :  { %v997_v40 = vmax.f32 %v945_v38, 0.0  ;;  %v1872_v41 = vpop.f32.mrb[84].mxu1 }
 0x396   :  { %v1873_v43 = vpop.f32.mrb[85].mxu1 }
 0x397   :  { %v1874_v44 = vadd.f32 %v1873_v43, %v1872_v41  ;;  %v1875_v47 = vpop.f32.mrb[86].mxu1  ;;  %v1016_v48 = vpack.c.bf16 %v997_v40, %v996_v39 }
 0x398   :  { %v1876_v51 = vpop.f32.mrb[87].mxu1 }
 0x399   :  { %v950_v52 = vadd.f32 %v1874_v44, %v2490_v25  ;;  %v1877_v53 = vadd.f32 %v1876_v51, %v1875_v47  ;;  %2002 = vmatprep.mubr.bf16.mxu0 %v1016_v48 }
 0x39b   :  { %v953_v54 = vadd.f32 %v1877_v53, %v2490_v25  ;;  %v998_v55 = vmax.f32 %v950_v52, 0.0 }
 0x39d   :  { %v999_v11 = vmax.f32 %v953_v54, 0.0  ;;  %v1878_v1 = vpop.f32.mrb[88].mxu1 }
 0x39e   :  { %v1879_v2 = vpop.f32.mrb[89].mxu1 }
 0x39f   :  { %v1880_v3 = vadd.f32 %v1879_v2, %v1878_v1  ;;  %v1017_v4 = vpack.c.bf16 %v999_v11, %v998_v55  ;;  %v1881_v5 = vpop.f32.mrb[90].mxu1 }
 0x3a0   :  { %v1882_v6 = vpop.f32.mrb[91].mxu1 }
 0x3a1   :  { %v958_v7 = vadd.f32 %v1880_v3, %v2490_v25  ;;  %2003 = vmatmul.mubr.bf16.gmra.mrb[88].mxu0 %v1017_v4  ;;  %v1883_v8 = vadd.f32 %v1882_v6, %v1881_v5 }
 0x3a3   :  { %v961_v9 = vadd.f32 %v1883_v8, %v2490_v25  ;;  %v1000_v10 = vmax.f32 %v958_v7, 0.0 }
 0x3a5   :  { %v1001_v12 = vmax.f32 %v961_v9, 0.0  ;;  %v1884_v13 = vpop.f32.mrb[92].mxu1 }
 0x3a6   :  { %v1885_v14 = vpop.f32.mrb[93].mxu1 }
 0x3a7   :  { %v1886_v15 = vadd.f32 %v1885_v14, %v1884_v13  ;;  %v1887_v16 = vpop.f32.mrb[94].mxu1  ;;  %v1018_v21 = vpack.c.bf16 %v1001_v12, %v1000_v10 }
 0x3a8   :  { %v1888_v23 = vpop.f32.mrb[95].mxu1 }
 0x3a9   :  { %v966_v45 = vadd.f32 %v1886_v15, %v2490_v25  ;;  %v1889_v46 = vadd.f32 %v1888_v23, %v1887_v16  ;;  %2006 = vmatprep.mubr.bf16.mxu0 %v1018_v21 }
 0x3ab   :  { %v969_v49 = vadd.f32 %v1889_v46, %v2490_v25  ;;  %v1002_v56 = vmax.f32 %v966_v45, 0.0 }
 0x3ad   :  { %v1003_v59 = vmax.f32 %v969_v49, 0.0 }
 0x3af   :  { %v1019_v22 = vpack.c.bf16 %v1003_v59, %v1002_v56 }
 0x3b1   :  { %2007 = vmatmul.mubr.bf16.gmra.mrb[92].mxu0 %v1019_v22 }
 0x414   :  { %v1980_v42 = vpop.f32.mrb[64].mxu0 }
 0x415   :  { %v1125_v60 = vpop.f32.mrb[65].mxu0  ;;  %v1134_v0 = vadd.f32 %v1980_v42, %v2527_v58 }
 0x416   :  { %v1981_v62 = vpop.f32.mrb[66].mxu0  ;;  %v1126_v61 = vadd.f32 %v2527_v58, %v1125_v60 }
 0x417   :  { %v1137_v50 = vadd.f32 %v1981_v62, %v2527_v58  ;;  %v1128_v57 = vpop.f32.mrb[67].mxu0 }
 0x418   :  { %v1129_v25 = vadd.f32 %v2527_v58, %v1128_v57 }
 0x419   :  { %v1555_v63 = vpack.c.bf16 %v1137_v50, %v1134_v0 }
 0x41a   :  { %v1550_v17 = vpack.c.bf16 %v1129_v25, %v1126_v61 }
 0x41b   :  { %1627 = vst [vmem:[%s2616_s7 + $0x8] sm:$0xff] %v1555_v63  }
 0x41c   :  { %1551 = vst [vmem:[%s2616_s7] sm:$0xff] %v1550_v17  }
 0x424   :  { %v1984_v18 = vpop.f32.mrb[68].mxu0 }
 0x425   :  { %v1141_v19 = vpop.f32.mrb[69].mxu0  ;;  %v1150_v24 = vadd.f32 %v1984_v18, %v2527_v58 }
 0x426   :  { %v1985_v20 = vpop.f32.mrb[70].mxu0  ;;  %v1142_v28 = vadd.f32 %v2527_v58, %v1141_v19 }
 0x427   :  { %v1153_v26 = vadd.f32 %v1985_v20, %v2527_v58  ;;  %v1144_v27 = vpop.f32.mrb[71].mxu0 }
 0x428   :  { %v1145_v29 = vadd.f32 %v2527_v58, %v1144_v27 }
 0x429   :  { %v1565_v30 = vpack.c.bf16 %v1153_v26, %v1150_v24 }
 0x42a   :  { %v1560_v31 = vpack.c.bf16 %v1145_v29, %v1142_v28 }
 0x42b   :  { %1629 = vst [vmem:[%s2616_s7 + $0x18] sm:$0xff] %v1565_v30  }
 0x42c   :  { %1628 = vst [vmem:[%s2616_s7 + $0x10] sm:$0xff] %v1560_v31  }
 0x434   :  { %v1988_v32 = vpop.f32.mrb[72].mxu0 }
 0x435   :  { %v1157_v33 = vpop.f32.mrb[73].mxu0  ;;  %v1166_v35 = vadd.f32 %v1988_v32, %v2527_v58 }
 0x436   :  { %v1989_v34 = vpop.f32.mrb[74].mxu0  ;;  %v1158_v38 = vadd.f32 %v2527_v58, %v1157_v33 }
 0x437   :  { %v1169_v36 = vadd.f32 %v1989_v34, %v2527_v58  ;;  %v1160_v37 = vpop.f32.mrb[75].mxu0 }
 0x438   :  { %v1161_v39 = vadd.f32 %v2527_v58, %v1160_v37 }
 0x439   :  { %v1575_v40 = vpack.c.bf16 %v1169_v36, %v1166_v35 }
 0x43a   :  { %v1570_v41 = vpack.c.bf16 %v1161_v39, %v1158_v38 }
 0x43b   :  { %1631 = vst [vmem:[%s2616_s7 + $0x28] sm:$0xff] %v1575_v40  }
 0x43c   :  { %1630 = vst [vmem:[%s2616_s7 + $0x20] sm:$0xff] %v1570_v41  }
 0x444   :  { %v1992_v43 = vpop.f32.mrb[76].mxu0 }
 0x445   :  { %v1173_v44 = vpop.f32.mrb[77].mxu0  ;;  %v1182_v48 = vadd.f32 %v1992_v43, %v2527_v58 }
 0x446   :  { %v1993_v47 = vpop.f32.mrb[78].mxu0  ;;  %v1174_v53 = vadd.f32 %v2527_v58, %v1173_v44 }
 0x447   :  { %v1185_v51 = vadd.f32 %v1993_v47, %v2527_v58  ;;  %v1176_v52 = vpop.f32.mrb[79].mxu0 }
 0x448   :  { %v1177_v54 = vadd.f32 %v2527_v58, %v1176_v52 }
 0x449   :  { %v1585_v55 = vpack.c.bf16 %v1185_v51, %v1182_v48 }
 0x44a   :  { %v1580_v11 = vpack.c.bf16 %v1177_v54, %v1174_v53 }
 0x44b   :  { %1633 = vst [vmem:[%s2616_s7 + $0x38] sm:$0xff] %v1585_v55  }
 0x44c   :  { %1632 = vst [vmem:[%s2616_s7 + $0x30] sm:$0xff] %v1580_v11  }
 0x454   :  { %v1996_v1 = vpop.f32.mrb[80].mxu0 }
 0x455   :  { %v1189_v2 = vpop.f32.mrb[81].mxu0  ;;  %v1198_v4 = vadd.f32 %v1996_v1, %v2527_v58 }
 0x456   :  { %v1997_v3 = vpop.f32.mrb[82].mxu0  ;;  %v1190_v7 = vadd.f32 %v2527_v58, %v1189_v2 }
 0x457   :  { %v1201_v5 = vadd.f32 %v1997_v3, %v2527_v58  ;;  %v1192_v6 = vpop.f32.mrb[83].mxu0 }
 0x458   :  { %v1193_v8 = vadd.f32 %v2527_v58, %v1192_v6 }
 0x459   :  { %v1595_v9 = vpack.c.bf16 %v1201_v5, %v1198_v4 }
 0x45a   :  { %v1590_v10 = vpack.c.bf16 %v1193_v8, %v1190_v7 }
 0x45b   :  { %1635 = vst [vmem:[%s2616_s7 + $0x48] sm:$0xff] %v1595_v9  }
 0x45c   :  { %1634 = vst [vmem:[%s2616_s7 + $0x40] sm:$0xff] %v1590_v10  }
 0x464   :  { %v2000_v12 = vpop.f32.mrb[84].mxu0 }
 0x465   :  { %v1205_v13 = vpop.f32.mrb[85].mxu0  ;;  %v1214_v15 = vadd.f32 %v2000_v12, %v2527_v58 }
 0x466   :  { %v2001_v14 = vpop.f32.mrb[86].mxu0  ;;  %v1206_v23 = vadd.f32 %v2527_v58, %v1205_v13 }
 0x467   :  { %v1217_v16 = vadd.f32 %v2001_v14, %v2527_v58  ;;  %v1208_v21 = vpop.f32.mrb[87].mxu0 }
 0x468   :  { %v1209_v45 = vadd.f32 %v2527_v58, %v1208_v21 }
 0x469   :  { %v1605_v46 = vpack.c.bf16 %v1217_v16, %v1214_v15 }
 0x46a   :  { %v1600_v49 = vpack.c.bf16 %v1209_v45, %v1206_v23 }
 0x46b   :  { %1637 = vst [vmem:[%s2616_s7 + $0x58] sm:$0xff] %v1605_v46  }
 0x46c   :  { %1636 = vst [vmem:[%s2616_s7 + $0x50] sm:$0xff] %v1600_v49  }
 0x474   :  { %v2004_v56 = vpop.f32.mrb[88].mxu0 }
 0x475   :  { %v1221_v59 = vpop.f32.mrb[89].mxu0  ;;  %v1230_v42 = vadd.f32 %v2004_v56, %v2527_v58 }
 0x476   :  { %v2005_v22 = vpop.f32.mrb[90].mxu0  ;;  %v1222_v0 = vadd.f32 %v2527_v58, %v1221_v59 }
 0x477   :  { %v1233_v60 = vadd.f32 %v2005_v22, %v2527_v58  ;;  %v1224_v62 = vpop.f32.mrb[91].mxu0 }
 0x478   :  { %v1225_v50 = vadd.f32 %v2527_v58, %v1224_v62 }
 0x479   :  { %v1615_v57 = vpack.c.bf16 %v1233_v60, %v1230_v42 }
 0x47a   :  { %v1610_v61 = vpack.c.bf16 %v1225_v50, %v1222_v0 }
 0x47b   :  { %1639 = vst [vmem:[%s2616_s7 + $0x68] sm:$0xff] %v1615_v57  }
 0x47c   :  { %1638 = vst [vmem:[%s2616_s7 + $0x60] sm:$0xff] %v1610_v61  }
 0x484   :  { %v2008_v25 = vpop.f32.mrb[92].mxu0 }
 0x485   :  { %v1237_v63 = vpop.f32.mrb[93].mxu0  ;;  %v1246_v18 = vadd.f32 %v2008_v25, %v2527_v58 }
 0x486   :  { %v2009_v17 = vpop.f32.mrb[94].mxu0  ;;  %v1238_v24 = vadd.f32 %v2527_v58, %v1237_v63 }
 0x487   :  { %v1249_v19 = vadd.f32 %v2009_v17, %v2527_v58  ;;  %v1240_v20 = vpop.f32.mrb[95].mxu0 }
 0x488   :  { %v1241_v26 = vadd.f32 %v2527_v58, %v1240_v20 }
 0x489   :  { %v1625_v27 = vpack.c.bf16 %v1249_v19, %v1246_v18 }
 0x48a   :  { %v1620_v28 = vpack.c.bf16 %v1241_v26, %v1238_v24 }
 0x48b   :  { %1641 = vst [vmem:[%s2616_s7 + $0x78] sm:$0xff] %v1625_v27  }
 0x48c   :  { %1640 = vst [vmem:[%s2616_s7 + $0x70] sm:$0xff] %v1620_v28  }

</bundles_post_ra>
